<compile_context>
chip_gen: v7x
topology: tpu7x:2x2x1
jax: 0.10.0
libtpu: 0.0.40
codegen_flags: <defaults>
</compile_context>

<pallas_src>
import functools
import math

import jax
import jax.numpy as jnp
from jax import lax
from jax.experimental import pallas as pl
from jax.experimental.pallas import tpu as pltpu


# 48 MiB: > default scoped limit (16 MiB v5e / 32 MiB v6e,v7x), < v7x physical.
_VMEM_LIMIT_BYTES = 48 * 1024 * 1024


# ---------------------------------------------------------------------------
# Tile-size helper (always returns a divisor of `size`; falls back to the full
# dim, which is always a legal block shape).
# ---------------------------------------------------------------------------

def _sub_tile(size, target):
    """Pick a sublane-aligned tile size dividing `size`, close to `target`."""
    if size <= target:
        return size
    for align in (16, 8):
        t = (target // align) * align
        while t >= align:
            if size % t == 0:
                return t
            t -= align
    return size


# ---------------------------------------------------------------------------
# Pallas kernels
# ---------------------------------------------------------------------------

def _fused_qkv_kernel(x_ref, wq_ref, wk_ref, wv_ref, q_ref, k_ref, v_ref):
    # Weights are VMEM-resident (constant index_map); one x tile feeds three
    # full-K MXU dots (bf16 in, f32 accumulate) -> no scratch, no pl.when.
    x = x_ref[...].astype(jnp.bfloat16)
    q_ref[...] = jnp.dot(x, wq_ref[...],
                         preferred_element_type=jnp.float32).astype(q_ref.dtype)
    k_ref[...] = jnp.dot(x, wk_ref[...],
                         preferred_element_type=jnp.float32).astype(k_ref.dtype)
    v_ref[...] = jnp.dot(x, wv_ref[...],
                         preferred_element_type=jnp.float32).astype(v_ref.dtype)


def _flash_attn_out_kernel(q_ref, k_ref, v_ref, wo_ref, bo_ref, o_ref,
                           m_ref, l_ref, acc_ref, *, heads, dim_head):
    # q/k/v blocks are in 'b n (h d)' layout: (1, tq, inner) / (1, tkv, inner).
    # Online softmax over the kv grid axis (axis 2).  1/sqrt(d) is already
    # folded into wq, so q needs no rescale here.  The output projection
    # (wo, bo) is fused into the ki==last finalize: the output block is
    # (1, tq, dim) and the merged-head attention never touches HBM.
    ki = pl.program_id(2)

    @pl.when(ki == 0)
    def _init():
        m_ref[...] = jnp.full_like(m_ref, -jnp.inf)
        l_ref[...] = jnp.zeros_like(l_ref)
        acc_ref[...] = jnp.zeros_like(acc_ref)

    q = q_ref[0]            # (tq,  inner) bf16, pre-scaled via wq
    k = k_ref[0]            # (tkv, inner) bf16
    v = v_ref[0]            # (tkv, inner) bf16

    for h in range(heads):  # heads is small; static unroll
        lo, hi = h * dim_head, (h + 1) * dim_head

        # scores: (tq, tkv), f32 accumulation on the MXU
        s = lax.dot_general(q[:, lo:hi], k[:, lo:hi],
                            (((1,), (1,)), ((), ())),
                            preferred_element_type=jnp.float32)

        m_prev = m_ref[h]                                          # (tq, 1)
        m_new = jnp.maximum(m_prev, jnp.max(s, axis=-1, keepdims=True))
        alpha = jnp.exp(m_prev - m_new)                            # f32 elementwise
        p = jnp.exp(s - m_new)                                     # (tq, tkv) f32

        l_ref[h] = alpha * l_ref[h] + jnp.sum(p, axis=-1, keepdims=True)
        m_ref[h] = m_new

        pv = lax.dot_general(p.astype(v.dtype), v[:, lo:hi],      # bf16 MXU
                             (((1,), (0,)), ((), ())),
                             preferred_element_type=jnp.float32)
        # per-head in-place accumulator update (no per-step concatenate)
        acc_ref[:, lo:hi] = alpha * acc_ref[:, lo:hi] + pv

    @pl.when(ki == pl.num_programs(2) - 1)
    def _finalize():
        # normalize per head in place, then one full lane-dense read
        for h in range(heads):
            lo, hi = h * dim_head, (h + 1) * dim_head
            inv_l = pl.reciprocal(l_ref[h], approx=True)           # EUP vrcp
            acc_ref[:, lo:hi] = acc_ref[:, lo:hi] * inv_l
        attn = acc_ref[...].astype(jnp.bfloat16)                   # (tq, inner)
        out = jnp.dot(attn, wo_ref[...],                           # fused out-proj
                      preferred_element_type=jnp.float32)
        o_ref[0] = (out + bo_ref[...]).astype(o_ref.dtype)


# ---------------------------------------------------------------------------
# Pallas wrappers
# ---------------------------------------------------------------------------

def fused_qkv_projection(x, wq_t, wk_t, wv_t, *, tm=512, out_dtype=jnp.bfloat16):
    """x: (M, K) f32; w*_t: (K, N) bf16 (pre-transposed, scale folded into wq).
    Returns q, k, v, each (M, N) out_dtype."""
    M, K = x.shape
    _, N = wq_t.shape
    tm = _sub_tile(M, tm)

    x_spec = pl.BlockSpec((tm, K), lambda i: (i, 0))
    w_spec = pl.BlockSpec((K, N), lambda i: (0, 0))    # constant -> DMA'd once
    o_spec = pl.BlockSpec((tm, N), lambda i: (i, 0))
    out_sd = jax.ShapeDtypeStruct((M, N), out_dtype)

    return pl.pallas_call(
        _fused_qkv_kernel,
        out_shape=(out_sd, out_sd, out_sd),
        grid=(M // tm,),
        in_specs=[x_spec, w_spec, w_spec, w_spec],
        out_specs=(o_spec, o_spec, o_spec),
        compiler_params=pltpu.CompilerParams(
            dimension_semantics=("parallel",),
            vmem_limit_bytes=_VMEM_LIMIT_BYTES),
    )(x, wq_t, wk_t, wv_t)


def flash_attention_out_proj(q, k, v, wo_t, bo, *, heads, dim_head, out_dtype,
                             tq=512, tkv=256):
    """q/k/v: (b, n, inner) bf16 in 'b n (h d)' layout; wo_t: (inner, dim) bf16;
    bo: (1, dim) f32.  Returns softmax(qk^T)v @ wo + bo, shape (b, n, dim)."""
    b, n, inner = q.shape
    dim = wo_t.shape[1]
    tq = _sub_tile(n, tq)
    tkv = _sub_tile(n, tkv)

    kernel = functools.partial(_flash_attn_out_kernel,
                               heads=heads, dim_head=dim_head)
    q_spec = pl.BlockSpec((1, tq, inner), lambda bb, qi, ki: (bb, qi, 0))
    kv_spec = pl.BlockSpec((1, tkv, inner), lambda bb, qi, ki: (bb, ki, 0))
    wo_spec = pl.BlockSpec((inner, dim), lambda bb, qi, ki: (0, 0))   # resident
    bo_spec = pl.BlockSpec((1, dim), lambda bb, qi, ki: (0, 0))       # resident
    o_spec = pl.BlockSpec((1, tq, dim), lambda bb, qi, ki: (bb, qi, 0))

    return pl.pallas_call(
        kernel,
        out_shape=jax.ShapeDtypeStruct((b, n, dim), out_dtype),
        grid=(b, n // tq, n // tkv),
        in_specs=[q_spec, kv_spec, kv_spec, wo_spec, bo_spec],
        out_specs=o_spec,
        scratch_shapes=[
            pltpu.VMEM((heads, tq, 1), jnp.float32),    # running max  m
            pltpu.VMEM((heads, tq, 1), jnp.float32),    # running sum  l
            pltpu.VMEM((tq, inner), jnp.float32),       # unnormalized accumulator
        ],
        compiler_params=pltpu.CompilerParams(
            dimension_semantics=("parallel", "parallel", "arbitrary"),
            vmem_limit_bytes=_VMEM_LIMIT_BYTES),
    )(q, k, v, wo_t, bo)


# ---------------------------------------------------------------------------
# FullAttention forward
# ---------------------------------------------------------------------------

def full_attention_forward(x, prepared, *, heads, dim_head):
    """x: (b, n, dim) float32 -> (b, n, dim) float32."""
    b, n, dim = x.shape
    inner = heads * dim_head

    x2 = x.reshape(b * n, dim)

    # Fused Q/K/V projection (qkv_bias=False); outputs stay in 'b n (h d)' layout.
    q2, k2, v2 = fused_qkv_projection(
        x2, prepared["wq_t"], prepared["wk_t"], prepared["wv_t"])
    q = q2.reshape(b, n, inner)
    k = k2.reshape(b, n, inner)
    v = v2.reshape(b, n, inner)

    # Flash attention with the output projection fused into the finalize.
    out = flash_attention_out_proj(q, k, v, prepared["wo_t"], prepared["bo"],
                                   heads=heads, dim_head=dim_head,
                                   out_dtype=x.dtype)

    # self.dropout has p=0.0 -> identity (no RNG kernel needed).
    return out


def init_params(key, dim, heads, dim_head):
    """PyTorch nn.Linear-style init: weight (out, in), uniform +-1/sqrt(fan_in)."""
    inner_dim = heads * dim_head
    kq, kk, kv, ko, kb = jax.random.split(key, 5)
    bound_in = 1.0 / jnp.sqrt(jnp.float32(dim))
    bound_out = 1.0 / jnp.sqrt(jnp.float32(inner_dim))
    return {
        "wq": jax.random.uniform(kq, (inner_dim, dim), jnp.float32, -bound_in, bound_in),
        "wk": jax.random.uniform(kk, (inner_dim, dim), jnp.float32, -bound_in, bound_in),
        "wv": jax.random.uniform(kv, (inner_dim, dim), jnp.float32, -bound_in, bound_in),
        "wo": jax.random.uniform(ko, (dim, inner_dim), jnp.float32, -bound_out, bound_out),
        "bo": jax.random.uniform(kb, (dim,), jnp.float32, -bound_out, bound_out),
    }


def prepare_params(params, dim_head):
    """Pre-transpose weights once, fold 1/sqrt(dim_head) into wq, cast to bf16."""
    scale = 1.0 / math.sqrt(float(dim_head))
    dim = params["bo"].shape[0]
    return {
        "wq_t": (params["wq"].T * scale).astype(jnp.bfloat16),   # scale folded in
        "wk_t": params["wk"].T.astype(jnp.bfloat16),
        "wv_t": params["wv"].T.astype(jnp.bfloat16),
        "wo_t": params["wo"].T.astype(jnp.bfloat16),
        "bo": params["bo"].astype(jnp.float32).reshape(1, dim),
    }


# Pure-JAX f32 reference for the sanity check.
def reference_forward(x, params, *, heads, dim_head):
    b, n, dim = x.shape
    q = x @ params["wq"].T
    k = x @ params["wk"].T
    v = x @ params["wv"].T

    def split(t):
        return t.reshape(b, n, heads, dim_head).transpose(0, 2, 1, 3)

    q, k, v = split(q), split(k), split(v)
    logits = jnp.einsum("bhxd,bhyd->bhxy", q, k) / jnp.sqrt(jnp.float32(dim_head))
    w = jax.nn.softmax(logits, axis=-1)
    o = jnp.einsum("bhnx,bhxd->bhnd", w, v)
    o = o.transpose(0, 2, 1, 3).reshape(b, n, heads * dim_head)
    return o @ params["wo"].T + params["bo"]


if __name__ == "__main__":
    # small shapes: batch=2, seq=8, dim=32, heads=4, dim_head=8 (inner_dim=32)
    B, N, DIM, HEADS, DIM_HEAD = 2, 8, 32, 4, 8

    key = jax.random.PRNGKey(0)
    kx, kp = jax.random.split(key)
    x = jax.random.normal(kx, (B, N, DIM), dtype=jnp.float32)
    params = init_params(kp, DIM, HEADS, DIM_HEAD)
    prepared = prepare_params(params, DIM_HEAD)

    out = full_attention_forward(x, prepared, heads=HEADS, dim_head=DIM_HEAD)
    out = jax.block_until_ready(out)

    ref = reference_forward(x, params, heads=HEADS, dim_head=DIM_HEAD)
    assert out.shape == (B, N, DIM)
    # bf16 MXU inputs + approx reciprocal -> loosened tolerance vs f32 reference.
    assert jnp.allclose(out, ref, atol=5e-2, rtol=5e-2), "mismatch vs JAX reference"

    print("KERNEL_OK")
</pallas_src>

<mosaic_0001>
module attributes {stable_mosaic.version = 11 : i64} {
  func.func @_fused_qkv_kernel(%arg0: i32, %arg1: memref<16x32xf32, #tpu.memory_space<vmem>>, %arg2: memref<32x32xbf16, #tpu.memory_space<vmem>>, %arg3: memref<32x32xbf16, #tpu.memory_space<vmem>>, %arg4: memref<32x32xbf16, #tpu.memory_space<vmem>>, %arg5: memref<16x32xbf16, #tpu.memory_space<vmem>>, %arg6: memref<16x32xbf16, #tpu.memory_space<vmem>>, %arg7: memref<16x32xbf16, #tpu.memory_space<vmem>>) attributes {dimension_semantics = [#tpu.dimension_semantics<parallel>], iteration_bounds = array<i64: 1>, scalar_prefetch = 0 : i64, scratch_operands = 0 : i64, tpu.core_type = #tpu.core_type<tc>, window_params = [{transform_indices = @transform_0, window_bounds = array<i64: 16, 32>}, {pipeline_mode = #tpu.pipeline_mode<synchronous>, transform_indices = @transform_1, window_bounds = array<i64: 32, 32>}, {pipeline_mode = #tpu.pipeline_mode<synchronous>, transform_indices = @transform_2, window_bounds = array<i64: 32, 32>}, {pipeline_mode = #tpu.pipeline_mode<synchronous>, transform_indices = @transform_3, window_bounds = array<i64: 32, 32>}, {transform_indices = @transform_4, window_bounds = array<i64: 16, 32>}, {transform_indices = @transform_5, window_bounds = array<i64: 16, 32>}, {transform_indices = @transform_6, window_bounds = array<i64: 16, 32>}]} {
    %c0 = arith.constant 0 : index
    %c0_0 = arith.constant 0 : index
    %0 = vector.load %arg1[%c0, %c0_0] : memref<16x32xf32, #tpu.memory_space<vmem>>, vector<16x32xf32>
    %1 = arith.truncf %0 : vector<16x32xf32> to vector<16x32xbf16>
    %c0_1 = arith.constant 0 : index
    %c0_2 = arith.constant 0 : index
    %2 = vector.load %arg2[%c0_1, %c0_2] : memref<32x32xbf16, #tpu.memory_space<vmem>>, vector<32x32xbf16>
    %cst = arith.constant dense<0.000000e+00> : vector<16x32xf32>
    %3 = tpu.matmul %1, %2, %cst {dimension_numbers = #tpu.dot_dimension_numbers<[1], [0], [0], [1], [0, 0, 1, 1], [], []>} : vector<16x32xbf16>, vector<32x32xbf16>, vector<16x32xf32> -> vector<16x32xf32>
    %4 = arith.truncf %3 : vector<16x32xf32> to vector<16x32xbf16>
    %c0_3 = arith.constant 0 : index
    %c0_4 = arith.constant 0 : index
    %5 = vector.load %arg5[%c0_3, %c0_4] : memref<16x32xbf16, #tpu.memory_space<vmem>>, vector<16x32xbf16>
    tpu.vector_store %arg5[%c0_3, %c0_4], %4 {strides = array<i32>} : memref<16x32xbf16, #tpu.memory_space<vmem>>, vector<16x32xbf16>,
    %c0_5 = arith.constant 0 : index
    %c0_6 = arith.constant 0 : index
    %6 = vector.load %arg3[%c0_5, %c0_6] : memref<32x32xbf16, #tpu.memory_space<vmem>>, vector<32x32xbf16>
    %cst_7 = arith.constant dense<0.000000e+00> : vector<16x32xf32>
    %7 = tpu.matmul %1, %6, %cst_7 {dimension_numbers = #tpu.dot_dimension_numbers<[1], [0], [0], [1], [0, 0, 1, 1], [], []>} : vector<16x32xbf16>, vector<32x32xbf16>, vector<16x32xf32> -> vector<16x32xf32>
    %8 = arith.truncf %7 : vector<16x32xf32> to vector<16x32xbf16>
    %c0_8 = arith.constant 0 : index
    %c0_9 = arith.constant 0 : index
    %9 = vector.load %arg6[%c0_8, %c0_9] : memref<16x32xbf16, #tpu.memory_space<vmem>>, vector<16x32xbf16>
    tpu.vector_store %arg6[%c0_8, %c0_9], %8 {strides = array<i32>} : memref<16x32xbf16, #tpu.memory_space<vmem>>, vector<16x32xbf16>,
    %c0_10 = arith.constant 0 : index
    %c0_11 = arith.constant 0 : index
    %10 = vector.load %arg4[%c0_10, %c0_11] : memref<32x32xbf16, #tpu.memory_space<vmem>>, vector<32x32xbf16>
    %cst_12 = arith.constant dense<0.000000e+00> : vector<16x32xf32>
    %11 = tpu.matmul %1, %10, %cst_12 {dimension_numbers = #tpu.dot_dimension_numbers<[1], [0], [0], [1], [0, 0, 1, 1], [], []>} : vector<16x32xbf16>, vector<32x32xbf16>, vector<16x32xf32> -> vector<16x32xf32>
    %12 = arith.truncf %11 : vector<16x32xf32> to vector<16x32xbf16>
    %c0_13 = arith.constant 0 : index
    %c0_14 = arith.constant 0 : index
    %13 = vector.load %arg7[%c0_13, %c0_14] : memref<16x32xbf16, #tpu.memory_space<vmem>>, vector<16x32xbf16>
    tpu.vector_store %arg7[%c0_13, %c0_14], %12 {strides = array<i32>} : memref<16x32xbf16, #tpu.memory_space<vmem>>, vector<16x32xbf16>,
    return
  }
  func.func @transform_0(%arg0: i32) -> (i32, i32) {
    %c0_i32 = arith.constant 0 : i32
    %c0_i32_0 = arith.constant 0 : i32
    return %arg0, %c0_i32 : i32, i32
  }
  func.func @transform_1(%arg0: i32) -> (i32, i32) {
    %c0_i32 = arith.constant 0 : i32
    %c0_i32_0 = arith.constant 0 : i32
    %c0_i32_1 = arith.constant 0 : i32
    return %c0_i32, %c0_i32_0 : i32, i32
  }
  func.func @transform_2(%arg0: i32) -> (i32, i32) {
    %c0_i32 = arith.constant 0 : i32
    %c0_i32_0 = arith.constant 0 : i32
    %c0_i32_1 = arith.constant 0 : i32
    return %c0_i32, %c0_i32_0 : i32, i32
  }
  func.func @transform_3(%arg0: i32) -> (i32, i32) {
    %c0_i32 = arith.constant 0 : i32
    %c0_i32_0 = arith.constant 0 : i32
    %c0_i32_1 = arith.constant 0 : i32
    return %c0_i32, %c0_i32_0 : i32, i32
  }
  func.func @transform_4(%arg0: i32) -> (i32, i32) {
    %c0_i32 = arith.constant 0 : i32
    %c0_i32_0 = arith.constant 0 : i32
    return %arg0, %c0_i32 : i32, i32
  }
  func.func @transform_5(%arg0: i32) -> (i32, i32) {
    %c0_i32 = arith.constant 0 : i32
    %c0_i32_0 = arith.constant 0 : i32
    return %arg0, %c0_i32 : i32, i32
  }
  func.func @transform_6(%arg0: i32) -> (i32, i32) {
    %c0_i32 = arith.constant 0 : i32
    %c0_i32_0 = arith.constant 0 : i32
    return %arg0, %c0_i32 : i32, i32
  }
}

</mosaic_0001>

<bundles_post_ra>
// kernel: tpu_custom_call.1
= control target key start
LH: loop header
LB: loop body
LE: loop exit
PB: predicated region body
PF: predicated region fallthrough
CT: control target
= control target key end

     0   :  { %12 = vsyncpa [#allocation3], 0  ;;  %s747_s0 = inlined_call_operand.hbm [shape: f32[16,32], index: 0, kind: input, shape index: {}]   ;;  %s748_s1 = inlined_call_operand.hbm [shape: bf16[32,32], index: 1, kind: input, shape index: {}]   ;;  %s749_s2 = inlined_call_operand.hbm [shape: bf16[32,32], index: 2, kind: input, shape index: {}]   ;;  %s750_s3 = inlined_call_operand.hbm [shape: bf16[32,32], index: 3, kind: input, shape index: {}]   ;;  %s751_s4 = inlined_call_operand.hbm [shape: bf16[16,32], index: 4, kind: output, shape index: {0}]   ;;  %s752_s5 = inlined_call_operand.hbm [shape: bf16[16,32], index: 5, kind: output, shape index: {1}]   ;;  %s753_s6 = inlined_call_operand.hbm [shape: bf16[16,32], index: 6, kind: output, shape index: {2}]  }
   0x1   :  { %13 = vsyncpa [#allocation6], 0 }
   0x2   :  { %14 = vsyncpa [#allocation9], 0 }
   0x3   :  { %15 = vsyncpa [#allocation4], 0 }
   0x4   :  { %16 = vsyncpa [#allocation12], 0  ;;  %s574_s21 = smov [#allocation5]   ;;  %s410_s25 = scalar_lea.hbm %s748_s1, 256 }
   0x5   :  { %s34_s22 = sshll.u32 %s574_s21, 4  ;;  %p411_p0 = scmp.ne.s32.totalorder %s748_s1, %s410_s25  ;;  %s35_s22 = int_to_ptr.vmem [resolvable:$true] %s34_s22 }
   0x6   :  { %p414_p1 = scmp.lt.u32.totalorder %s410_s25, %s748_s1 }
   0x8   :  { %p416_p2 = pnand %p414_p1, %p411_p0 }
   0xa   :  { %419 = shalt.err (!%p416_p2)
}
   0xb   :  { %s420_s30 = scalar_lea.vmem %s35_s22, 256  ;;  %p425_p4 = scmp.lt.s32.totalorder %s35_s22, %s35_s22 }
   0xc   :  { %p421_p3 = scmp.ne.s32.totalorder %s35_s22, %s420_s30  ;;  %p426_p5 = scmp.lt.s32.totalorder %s420_s30, %s420_s30 }
   0xe   :  { %p427_p6 = por %p426_p5, %p425_p4 }
  0x10   :  { %p428_p7 = pnand %p427_p6, %p421_p3 }
  0x12   :  { %431 = shalt.err (!%p428_p7)
}
  0x13   :  { %s575_s7 = smov 64   ;;  %s576_s8 = smov 4  }
  0x14   :  { %40 = dma.hbm_to_vmem [thread:$0]  %s748_s1, 256, %s35_s22, [#allocation6], %s575_s7, %s575_s7, %s576_s8  }
  0x15   :  { %s577_s11 = smov [#allocation2]   ;;  %s432_s15 = scalar_lea.hbm %s747_s0, 256 }
  0x16   :  { %s22_s12 = sshll.u32 %s577_s11, 4  ;;  %p433_p8 = scmp.ne.s32.totalorder %s747_s0, %s432_s15  ;;  %s23_s12 = int_to_ptr.vmem [resolvable:$true] %s22_s12 }
  0x17   :  { %p436_p9 = scmp.lt.u32.totalorder %s432_s15, %s747_s0 }
  0x19   :  { %p438_p10 = pnand %p436_p9, %p433_p8 }
  0x1b   :  { %441 = shalt.err (!%p438_p10)
}
  0x1c   :  { %s442_s20 = scalar_lea.vmem %s23_s12, 256  ;;  %p447_p12 = scmp.lt.s32.totalorder %s23_s12, %s23_s12 }
  0x1d   :  { %p443_p11 = scmp.ne.s32.totalorder %s23_s12, %s442_s20  ;;  %p448_p13 = scmp.lt.s32.totalorder %s442_s20, %s442_s20 }
  0x1f   :  { %p449_p0 = por %p448_p13, %p447_p12 }
  0x21   :  { %p450_p1 = pnand %p449_p0, %p443_p11 }
  0x23   :  { %453 = shalt.err (!%p450_p1)
}
  0x24   :  { %s578_s1 = smov 128   ;;  %s579_s21 = smov 8  }
  0x25   :  { %28 = dma.hbm_to_vmem [thread:$0]  %s747_s0, 256, %s23_s12, [#allocation3], %s578_s1, %s578_s1, %s579_s21  }
  0x26   :  { %s580_s24 = smov [#allocation7]   ;;  %s581_s26 = smov [#allocation8]  }
  0x27   :  { %s46_s25 = sshll.u32 %s580_s24, 4  ;;  %s58_s27 = sshll.u32 %s581_s26, 4  ;;  %s47_s25 = int_to_ptr.vmem [resolvable:$true] %s46_s25  ;;  %s649_s27 = int_to_ptr.vmem [resolvable:$true] %s58_s27 }
  0x28   :  { %s454_s30 = scalar_lea.hbm %s749_s2, 256 }
  0x29   :  { %p455_p2 = scmp.ne.s32.totalorder %s749_s2, %s454_s30  ;;  %p458_p3 = scmp.lt.u32.totalorder %s454_s30, %s749_s2 }
  0x2b   :  { %p460_p4 = pnand %p458_p3, %p455_p2 }
  0x2d   :  { %463 = shalt.err (!%p460_p4)
}
  0x2e   :  { %s464_s0 = scalar_lea.vmem %s47_s25, 256  ;;  %p469_p6 = scmp.lt.s32.totalorder %s47_s25, %s47_s25 }
  0x2f   :  { %p465_p5 = scmp.ne.s32.totalorder %s47_s25, %s464_s0  ;;  %p470_p7 = scmp.lt.s32.totalorder %s464_s0, %s464_s0 }
  0x31   :  { %p471_p8 = por %p470_p7, %p469_p6 }
  0x33   :  { %p472_p9 = pnand %p471_p8, %p465_p5 }
  0x35   :  { %475 = shalt.err (!%p472_p9)
}
  0x36   :  { %52 = dma.hbm_to_vmem [thread:$0]  %s749_s2, 256, %s47_s25, [#allocation6], %s575_s7, %s575_s7, %s576_s8  }
  0x37   :  { %s476_s17 = scalar_lea.hbm %s750_s3, 256 }
  0x38   :  { %p477_p10 = scmp.ne.s32.totalorder %s750_s3, %s476_s17  ;;  %p480_p11 = scmp.lt.u32.totalorder %s476_s17, %s750_s3 }
  0x3a   :  { %p482_p12 = pnand %p480_p11, %p477_p10 }
  0x3c   :  { %485 = shalt.err (!%p482_p12)
}
  0x3d   :  { %s486_s21 = scalar_lea.vmem %s649_s27, 256  ;;  %p491_p0 = scmp.lt.s32.totalorder %s649_s27, %s649_s27 }
  0x3e   :  { %p487_p13 = scmp.ne.s32.totalorder %s649_s27, %s486_s21  ;;  %p492_p1 = scmp.lt.s32.totalorder %s486_s21, %s486_s21 }
  0x40   :  { %p493_p2 = por %p492_p1, %p491_p0 }
  0x42   :  { %p494_p3 = pnand %p493_p2, %p487_p13 }
  0x44   :  { %497 = shalt.err (!%p494_p3)
}
  0x45   :  { %64 = dma.hbm_to_vmem [thread:$0]  %s750_s3, 256, %s649_s27, [#allocation9], %s575_s7, %s575_s7, %s576_s8  }
  0x46   :  { %564 = dma.done.wait [#allocation3], 256  }
  0x47   :  { %565 = vsyncadd [#allocation3], 4294967040 }
  0x48   :  { %566 = dma.done.wait [#allocation6], 512  }
  0x49   :  { %567 = vsyncadd [#allocation6], 4294966784 }
  0x4a   :  { %568 = dma.done.wait [#allocation9], 256  }
  0x4b   :  { %569 = vsyncadd [#allocation9], 4294967040  ;;  %v582_v0 = vmov 0.0   ;;  %vm583_vm0 = vmmov 0   ;;  %v404_v1 = vld [vmem:[#allocation5] sm:$0xff]   ;;  %v405_v2 = vld [vmem:[#allocation5 + $0x8] sm:$0xff]  }
  0x4c   :  { %367 = vmatprep.subr.bf16.mxu0 %v582_v0  ;;  %375 = vmatprep.subr.bf16.mxu1 %v582_v0  ;;  %v406_v3 = vld [vmem:[#allocation7] sm:$0xff]   ;;  %v79_v5 = vld [vmem:[#allocation2 + $0x8] sm:$0xff]  ;;  %vm97_vm1 = vcmask 261120   ;;  %v407_v8 = vld [vmem:[#allocation8] sm:$0xff]   ;;  %vm150_vm2 = vcmask 257024   ;;  %s584_s3 = smov [#allocation10]  }
  0x4d   :  { %371 = vmatprep.mubr.msk.bf16.mxu0 %vm583_vm0, %v582_v0  ;;  %379 = vmatprep.mubr.msk.bf16.mxu1 %vm583_vm0, %v582_v0  ;;  %v78_v4 = vld [vmem:[#allocation2] sm:$0xff]  ;;  %v408_v7 = vld [vmem:[#allocation7 + $0x8] sm:$0xff]   ;;  %v409_v9 = vld [vmem:[#allocation8 + $0x8] sm:$0xff]   ;;  %s292_s23 = sshll.u32 %s584_s3, 4  ;;  %s585_s24 = smov [#allocation11]   ;;  %s293_s23 = int_to_ptr.vmem [resolvable:$true] %s292_s23 }
  0x4e   :  { %368 = vmatpush3.bf16.msra.mxu0 %v404_v1  ;;  %376 = vmatpush3.bf16.msra.mxu1 %v406_v3  ;;  %v80_v6 = vpack.c.bf16 %v79_v5, %v78_v4  ;;  %s304_s25 = sshll.u32 %s585_s24, 4  ;;  %s498_s26 = scalar_lea.vmem %s293_s23, 128  ;;  %s692_s25 = int_to_ptr.vmem [resolvable:$true] %s304_s25 }
  0x4f   :  { %369 = vmatprep.subr.bf16.mxu0 %v582_v0  ;;  %377 = vmatprep.subr.bf16.mxu1 %v582_v0  ;;  %p499_p4 = scmp.ne.s32.totalorder %s293_s23, %s498_s26  ;;  %p503_p5 = scmp.lt.s32.totalorder %s293_s23, %s293_s23 }
  0x50   :  { %p504_p6 = scmp.lt.s32.totalorder %s498_s26, %s498_s26 }
  0x52   :  { %370 = vmatpush3.bf16.msra.mxu0 %v405_v2  ;;  %378 = vmatpush3.bf16.msra.mxu1 %v408_v7  ;;  %p505_p7 = por %p504_p6, %p503_p5 }
  0x53   :  { %383 = vmatprep.subr.bf16.mxu0 %v582_v0 }
  0x54   :  { %p506_p8 = pnand %p505_p7, %p499_p4 }
  0x55   :  { %372 = vmatmul.mubr.msk.bf16.vlgmr.msra.gmra.mrb[0].mxu0 %vm97_vm1, %v80_v6  ;;  %380 = vmatmul.mubr.msk.bf16.vlgmr.msra.gmra.mrb[0].mxu1 %vm97_vm1, %v80_v6 }
  0x56   :  { %384 = vmatpush3.bf16.msra.mxu0 %v407_v8  ;;  %387 = vmatprep.mubr.msk.bf16.mxu0 %vm583_vm0, %v582_v0 }
  0x57   :  { %385 = vmatprep.subr.bf16.mxu0 %v582_v0 }
  0x5a   :  { %386 = vmatpush3.bf16.msra.mxu0 %v409_v9 }
  0x5d   :  { %388 = vmatmul.mubr.msk.bf16.vlgmr.msra.gmra.mrb[4].mxu0 %vm97_vm1, %v80_v6 }
 0x128   :  { %v135_v10 = vpop.f32.mrb[0].mxu0  ;;  %v203_v14 = vpop.f32.mrb[0].mxu1 }
 0x129   :  { %v352_v11 = vpack.c.bf16 %v135_v10, %v135_v10  ;;  %v373_v12 = vpop.f32.mrb[1].mxu0  ;;  %v354_v17 = vpack.c.bf16 %v203_v14, %v203_v14  ;;  %v381_v18 = vpop.f32.mrb[1].mxu1 }
 0x12a   :  { %v138_v13 = vpop.f32.mrb[2].mxu0  ;;  %v206_v19 = vpop.f32.mrb[2].mxu1 }
 0x12b   :  { %v353_v15 = vpack.c.bf16 %v138_v13, %v138_v13  ;;  %v374_v16 = vpop.f32.mrb[3].mxu0  ;;  %151 = vst.msk [vmem:[#allocation10] sm:$0xf] %vm150_vm2, %v352_v11  ;;  %v355_v20 = vpack.c.bf16 %v206_v19, %v206_v19  ;;  %v382_v21 = vpop.f32.mrb[3].mxu1  ;;  %218 = vst.msk [vmem:[#allocation11] sm:$0xf] %vm150_vm2, %v354_v17 }
 0x12d   :  { %152 = vst.msk [vmem:[#allocation10 + $0x4] sm:$0xf] %vm150_vm2, %v353_v15 }
 0x12e   :  { %509 = shalt.err (!%p506_p8)
}
 0x12f   :  { %s510_s29 = scalar_lea.hbm %s751_s4, 128 }
 0x130   :  { %p511_p9 = scmp.ne.s32.totalorder %s751_s4, %s510_s29  ;;  %p514_p10 = scmp.lt.u32.totalorder %s510_s29, %s751_s4 }
 0x132   :  { %p516_p11 = pnand %p514_p10, %p511_p9 }
 0x134   :  { %519 = shalt.err (!%p516_p11)
}
 0x135   :  { %298 = dma.vmem_to_hbm [thread:$0]  %s293_s23, 128, %s751_s4, [#allocation4], %s575_s7, %s575_s7, %s576_s8   ;;  %219 = vst.msk [vmem:[#allocation11 + $0x4] sm:$0xf] %vm150_vm2, %v355_v20  ;;  %v270_v22 = vpop.f32.mrb[4].mxu0 }
 0x136   :  { %s586_s12 = smov [#allocation13]   ;;  %s520_s15 = scalar_lea.vmem %s692_s25, 128 }
 0x137   :  { %s316_s14 = sshll.u32 %s586_s12, 4  ;;  %p521_p12 = scmp.ne.s32.totalorder %s692_s25, %s520_s15  ;;  %s317_s14 = int_to_ptr.vmem [resolvable:$true] %s316_s14 }
 0x138   :  { %p525_p13 = scmp.lt.s32.totalorder %s692_s25, %s692_s25  ;;  %p526_p0 = scmp.lt.s32.totalorder %s520_s15, %s520_s15 }
 0x13a   :  { %p527_p1 = por %p526_p0, %p525_p13 }
 0x13c   :  { %p528_p2 = pnand %p527_p1, %p521_p12 }
 0x13e   :  { %531 = shalt.err (!%p528_p2)
}
 0x13f   :  { %s532_s18 = scalar_lea.hbm %s752_s5, 128 }
 0x140   :  { %p533_p3 = scmp.ne.s32.totalorder %s752_s5, %s532_s18  ;;  %p536_p4 = scmp.lt.u32.totalorder %s532_s18, %s752_s5 }
 0x142   :  { %p538_p5 = pnand %p536_p4, %p533_p3 }
 0x144   :  { %541 = shalt.err (!%p538_p5)
}
 0x145   :  { %310 = dma.vmem_to_hbm [thread:$0]  %s692_s25, 128, %s752_s5, [#allocation12], %s575_s7, %s575_s7, %s576_s8   ;;  %v356_v23 = vpack.c.bf16 %v270_v22, %v270_v22  ;;  %v389_v24 = vpop.f32.mrb[5].mxu0 }
 0x146   :  { %v273_v25 = vpop.f32.mrb[6].mxu0  ;;  %s542_s22 = scalar_lea.vmem %s317_s14, 128  ;;  %p547_p7 = scmp.lt.s32.totalorder %s317_s14, %s317_s14 }
 0x147   :  { %285 = vst.msk [vmem:[#allocation13] sm:$0xf] %vm150_vm2, %v356_v23  ;;  %v357_v26 = vpack.c.bf16 %v273_v25, %v273_v25  ;;  %v390_v27 = vpop.f32.mrb[7].mxu0  ;;  %p543_p6 = scmp.ne.s32.totalorder %s317_s14, %s542_s22  ;;  %p548_p8 = scmp.lt.s32.totalorder %s542_s22, %s542_s22 }
 0x149   :  { %286 = vst.msk [vmem:[#allocation13 + $0x4] sm:$0xf] %vm150_vm2, %v357_v26  ;;  %p549_p9 = por %p548_p8, %p547_p7 }
 0x14b   :  { %p550_p10 = pnand %p549_p9, %p543_p6 }
 0x14d   :  { %553 = shalt.err (!%p550_p10)
}
 0x14e   :  { %s554_s5 = scalar_lea.hbm %s753_s6, 128 }
 0x14f   :  { %p555_p11 = scmp.ne.s32.totalorder %s753_s6, %s554_s5  ;;  %p558_p12 = scmp.lt.u32.totalorder %s554_s5, %s753_s6 }
 0x151   :  { %p560_p13 = pnand %p558_p12, %p555_p11 }
 0x153   :  { %563 = shalt.err (!%p560_p13)
}
 0x154   :  { %322 = dma.vmem_to_hbm [thread:$0]  %s317_s14, 128, %s753_s6, [#allocation12], %s575_s7, %s575_s7, %s576_s8  }
 0x155   :  { %570 = dma.done.wait [#allocation4], 128  }
 0x156   :  { %571 = vsyncadd [#allocation4], 4294967168 }
 0x157   :  { %572 = dma.done.wait [#allocation12], 256  }
 0x158   :  { %573 = vsyncadd [#allocation12], 4294967040 }
 0x159   :  { %332 = vsyncpa [#allocation3], 1 }
 0x15a   :  { %333 = vsyncpa [#allocation6], 1 }
 0x15b   :  { %334 = vsyncpa [#allocation9], 1 }
 0x15c   :  { %335 = vsyncpa [#allocation4], 1 }
 0x15d   :  { %336 = vsyncpa [#allocation12], 1 }

</bundles_post_ra>
